<compile_context>
chip_gen: v7x
topology: tpu7x:2x2x1
jax: 0.10.0
libtpu: 0.0.40
codegen_flags: <defaults>
</compile_context>

<pallas_src>
import functools
import math

import jax
import jax.numpy as jnp
from jax.experimental import pallas as pl
from jax.experimental.pallas import tpu as pltpu


def _cdiv(a, b):
    return (a + b - 1) // b


def _round_up(x, m):
    return _cdiv(x, m) * m


def _round_down(x, m):
    return (x // m) * m


def _vmem_capacity_bytes():
    """Per-TensorCore VMEM capacity; conservative fallback if unavailable."""
    try:
        cap = getattr(pltpu.get_tpu_info(), "vmem_capacity_bytes", None)
        if cap:
            return int(cap)
    except Exception:
        pass
    return 64 << 20  # v7x per-TC capacity: safe lower bound for all gens


def _embed_kernel(ids_ref, emb_ref, out_ref, *, scale, fold_scale):
    """One grid step: embed a tile of tokens.

    ids_ref : VMEM (tile, 1)   int32   token ids for this tile
    emb_ref : VMEM (vocab_p, d_model)  full (vocab-padded) embedding table
    out_ref : VMEM (tile, d_model)     output tile
    """
    ids = ids_ref[...]                                    # (tile, 1) int32
    tile = ids.shape[0]
    vocab_p = emb_ref.shape[0]

    # Row selection as a one-hot matmul (vectorized gather on the MXU).
    col = jax.lax.broadcasted_iota(jnp.int32, (tile, vocab_p), 1)
    hit = col == ids                                      # (tile, vocab_p) bool

    if fold_scale:
        # f32 table: fold sqrt(d_model) into the select that builds the
        # one-hot (free -- the select exists anyway); result stays exact.
        one_hot = jnp.where(hit, jnp.float32(scale), jnp.float32(0.0))
        rows = jnp.dot(one_hot, emb_ref[...],
                       preferred_element_type=jnp.float32)
    else:
        # Narrow (e.g. bf16) table: keep the one-hot 0/1 in the table dtype so
        # the MXU runs at the narrow-dtype rate; apply the scale once on the
        # f32 accumulator so sqrt(d_model) is not rounded to bf16.
        one_hot = hit.astype(emb_ref.dtype)
        rows = jnp.dot(one_hot, emb_ref[...],
                       preferred_element_type=jnp.float32) * jnp.float32(scale)

    # Single lane-dense, unmasked store per grid step.
    out_ref[...] = rows.astype(out_ref.dtype)


def input_embeddings(x_ids, emb_table, d_model, *, max_tile=2048):
    """Forward pass: embedding(x) * sqrt(d_model).

    x_ids:     (batch, seq) integer token ids
    emb_table: (vocab, d_model) embedding weights (floating point)
    returns:   (batch, seq, d_model), dtype of emb_table
    """
    batch, seq = x_ids.shape
    vocab, dm = emb_table.shape
    assert dm == d_model
    out_dtype = emb_table.dtype
    if not jnp.issubdtype(out_dtype, jnp.floating):
        # TODO(synk): integer (quantized) tables need the DMA-gather path --
        # v7x's MXU has no integer matmul, so the one-hot path is float-only.
        raise NotImplementedError("one-hot embedding path requires a float table")
    fold_scale = out_dtype == jnp.float32
    scale = float(math.sqrt(d_model))
    itemsize = jnp.dtype(out_dtype).itemsize
    sub = max(8, 32 // itemsize)        # sublane multiple: 8 f32 / 16 bf16 / 32 i8

    # --- pad vocab to a lane-dense, MXU-aligned contraction width ----------
    vocab_p = _round_up(vocab, 128)
    if vocab_p != vocab:
        emb_table = jnp.pad(emb_table, ((0, vocab_p - vocab), (0, 0)))

    n_tokens = batch * seq

    # --- VMEM-budgeted tile size -------------------------------------------
    vmem_cap = _vmem_capacity_bytes()
    usable = vmem_cap - (8 << 20)                        # compiler-scratch headroom
    table_resident = 2 * vocab_p * d_model * itemsize    # BlockSpec double-buffers
    per_token = 2 * d_model * itemsize + 2 * 128 * 4     # out tile + lane-padded ids
    tile_budget = usable - table_resident - (2 << 20)
    if tile_budget < sub * per_token:
        # TODO(synk): table too large to keep resident (notably v7x 64 MiB):
        # switch to memory_space=pl.ANY + double-buffered per-row DMA gather.
        raise NotImplementedError(
            "embedding table too large for the VMEM-resident one-hot path")
    tile_cap = max(sub, _round_down(min(max_tile, tile_budget // per_token), sub))

    # --- choose tile so tile * n_tiles == sublane-rounded token count -------
    # (no output over-padding -> the final slice/reshape is a no-op whenever
    # n_tokens is sublane-aligned), with >= 2 grid steps for v7x megacore.
    n_pad_min = _round_up(n_tokens, sub)
    n_tiles = max(1, _cdiv(n_pad_min, tile_cap))
    if n_tiles == 1 and n_pad_min >= 2 * sub:
        n_tiles = 2                                      # span both v7x TensorCores
    tile = _round_up(_cdiv(n_pad_min, n_tiles), sub)
    padded_n = tile * n_tiles

    flat_ids = x_ids.reshape(n_tokens).astype(jnp.int32)
    if padded_n != n_tokens:
        flat_ids = jnp.pad(flat_ids, (0, padded_n - n_tokens))  # pad id = 0
    # TODO(synk): ship ids lane-dense as (n_tiles, tile) blocks (sublane
    # broadcast in-kernel) to cut the id tile's VMEM/DMA ~32x; modest win,
    # measure before committing.
    ids_2d = flat_ids.reshape(padded_n, 1)

    footprint = table_resident + tile * per_token
    vmem_limit = int(min(usable, max(32 << 20, footprint + (8 << 20))))

    kernel = functools.partial(_embed_kernel, scale=scale, fold_scale=fold_scale)

    out_padded = pl.pallas_call(
        kernel,
        out_shape=jax.ShapeDtypeStruct((padded_n, d_model), out_dtype),
        grid=(n_tiles,),
        in_specs=[
            # Per-tile ids: constant footprint regardless of sequence length.
            pl.BlockSpec((tile, 1), lambda i: (i, 0)),
            # Full table resident in VMEM; constant index map -> no re-DMA
            # across grid steps.
            # TODO(synk): pipeline_mode=pl.Buffered(1) here would drop the
            # redundant second table buffer (helps mid-size tables on v7x).
            pl.BlockSpec((vocab_p, d_model), lambda i: (0, 0)),
        ],
        out_specs=pl.BlockSpec((tile, d_model), lambda i: (i, 0)),
        compiler_params=pltpu.CompilerParams(
            dimension_semantics=("parallel",),   # independent tiles -> megacore
            vmem_limit_bytes=vmem_limit,
        ),
    )(ids_2d, emb_table)

    out = out_padded if padded_n == n_tokens else out_padded[:n_tokens]
    return out.reshape(batch, seq, d_model)


if __name__ == "__main__":
    d_model = 128
    vocab_size = 64

    key = jax.random.PRNGKey(0)
    k_emb, k1, k2, k3 = jax.random.split(key, 4)

    # nn.Embedding default init ~ N(0, 1)
    emb_f32 = jax.random.normal(k_emb, (vocab_size, d_model), dtype=jnp.float32)
    scale = math.sqrt(d_model)

    def ref_embed(table, ids):
        rows = jnp.take(table, ids.reshape(-1), axis=0).astype(jnp.float32)
        return (rows * scale).astype(table.dtype).reshape(*ids.shape, d_model)

    # Case 1: small shape consistent with the module (batch=2, seq=8), f32.
    x1 = jax.random.randint(k1, (2, 8), 0, vocab_size, dtype=jnp.int32)
    o1 = jax.block_until_ready(input_embeddings(x1, emb_f32, d_model))
    assert o1.shape == (2, 8, d_model)
    assert jnp.allclose(o1, ref_embed(emb_f32, x1), atol=1e-5, rtol=1e-5)

    # Case 2: multi-tile, padding-free path (1200 tokens -> 2 tiles of 600).
    x2 = jax.random.randint(k2, (4, 300), 0, vocab_size, dtype=jnp.int32)
    o2 = jax.block_until_ready(input_embeddings(x2, emb_f32, d_model))
    assert o2.shape == (4, 300, d_model)
    assert jnp.allclose(o2, ref_embed(emb_f32, x2), atol=1e-5, rtol=1e-5)

    # Case 3: misaligned token count -> minimal sublane padding + slice.
    x3 = jax.random.randint(k3, (1, 13), 0, vocab_size, dtype=jnp.int32)
    o3 = jax.block_until_ready(input_embeddings(x3, emb_f32, d_model))
    assert o3.shape == (1, 13, d_model)
    assert jnp.allclose(o3, ref_embed(emb_f32, x3), atol=1e-5, rtol=1e-5)

    # Case 4: bf16 table exercises the narrow-dtype one-hot + f32-scale path.
    emb_bf16 = emb_f32.astype(jnp.bfloat16)
    o4 = jax.block_until_ready(input_embeddings(x1, emb_bf16, d_model))
    r4 = ref_embed(emb_bf16, x1)
    assert o4.dtype == jnp.bfloat16
    assert jnp.allclose(o4.astype(jnp.float32), r4.astype(jnp.float32),
                        atol=1e-1, rtol=2e-2)

    print("KERNEL_OK")
</pallas_src>

<mosaic_0001>
module attributes {stable_mosaic.version = 11 : i64} {
  func.func @_embed_kernel(%arg0: i32, %arg1: memref<8x1xi32, #tpu.memory_space<vmem>>, %arg2: memref<128x128xf32, #tpu.memory_space<vmem>>, %arg3: memref<8x128xf32, #tpu.memory_space<vmem>>) attributes {dimension_semantics = [#tpu.dimension_semantics<parallel>], iteration_bounds = array<i64: 2>, scalar_prefetch = 0 : i64, scratch_operands = 0 : i64, tpu.core_type = #tpu.core_type<tc>, window_params = [{transform_indices = @transform_0, window_bounds = array<i64: 8, 1>}, {pipeline_mode = #tpu.pipeline_mode<synchronous>, transform_indices = @transform_1, window_bounds = array<i64: 128, 128>}, {transform_indices = @transform_2, window_bounds = array<i64: 8, 128>}]} {
    %c0 = arith.constant 0 : index
    %c0_0 = arith.constant 0 : index
    %0 = vector.load %arg1[%c0, %c0_0] : memref<8x1xi32, #tpu.memory_space<vmem>>, vector<8x1xi32>
    %1 = tpu.iota {dimensions = array<i32: 1>} : vector<8x128xi32>
    %2 = vector.broadcast %0 : vector<8x1xi32> to vector<8x128xi32>
    %3 = arith.cmpi eq, %1, %2 : vector<8x128xi32>
    %cst = arith.constant 11.3137083 : f32
    %cst_1 = arith.constant 0.000000e+00 : f32
    %4 = vector.broadcast %cst : f32 to vector<8x128xf32>
    %5 = vector.broadcast %cst_1 : f32 to vector<8x128xf32>
    %6 = arith.select %3, %4, %5 : vector<8x128xi1>, vector<8x128xf32>
    %c0_2 = arith.constant 0 : index
    %c0_3 = arith.constant 0 : index
    %7 = vector.load %arg2[%c0_2, %c0_3] : memref<128x128xf32, #tpu.memory_space<vmem>>, vector<128x128xf32>
    %cst_4 = arith.constant dense<0.000000e+00> : vector<8x128xf32>
    %8 = tpu.matmul %6, %7, %cst_4 {dimension_numbers = #tpu.dot_dimension_numbers<[1], [0], [0], [1], [0, 0, 1, 1], [], []>} : vector<8x128xf32>, vector<128x128xf32>, vector<8x128xf32> -> vector<8x128xf32>
    %c0_5 = arith.constant 0 : index
    %c0_6 = arith.constant 0 : index
    %9 = vector.load %arg3[%c0_5, %c0_6] : memref<8x128xf32, #tpu.memory_space<vmem>>, vector<8x128xf32>
    tpu.vector_store %arg3[%c0_5, %c0_6], %8 {strides = array<i32>} : memref<8x128xf32, #tpu.memory_space<vmem>>, vector<8x128xf32>,
    return
  }
  func.func @transform_0(%arg0: i32) -> (i32, i32) {
    %c0_i32 = arith.constant 0 : i32
    %c0_i32_0 = arith.constant 0 : i32
    return %arg0, %c0_i32 : i32, i32
  }
  func.func @transform_1(%arg0: i32) -> (i32, i32) {
    %c0_i32 = arith.constant 0 : i32
    %c0_i32_0 = arith.constant 0 : i32
    %c0_i32_1 = arith.constant 0 : i32
    return %c0_i32, %c0_i32_0 : i32, i32
  }
  func.func @transform_2(%arg0: i32) -> (i32, i32) {
    %c0_i32 = arith.constant 0 : i32
    %c0_i32_0 = arith.constant 0 : i32
    return %arg0, %c0_i32 : i32, i32
  }
}

</mosaic_0001>

<bundles_post_ra>
// kernel: tpu_custom_call.1
= control target key start
LH: loop header
LB: loop body
LE: loop exit
PB: predicated region body
PF: predicated region fallthrough
CT: control target
= control target key end

     0   :  { %7 = vsyncpa [#allocation3], 0  ;;  %s736_s0 = inlined_call_operand.vmem [shape: s32[16,1], index: 0, kind: input, shape index: {}]   ;;  %s737_s1 = inlined_call_operand.hbm [shape: f32[128,128], index: 1, kind: input, shape index: {}]   ;;  %s738_s2 = inlined_call_operand.hbm [shape: f32[16,128], index: 2, kind: output, shape index: {}]  }
   0x1   :  { %8 = vsyncpa [#allocation4], 0 }
   0x2   :  { %10 = vsyncpa [#allocation4 + $0x1], 0  ;;  %s601_s9 = smov 0   ;;  %s603_s10 = smov 0  }
   0x3   :  { %s605_s11 = smov 0   ;;  %s607_s12 = smov 0  }
   0x4 LB: > { %s622_s13 = sadd.s32 4294967295, %s575_s12   ;;  %s334_s14 = sadd.s32 4294967294, %s575_s12   ;;  %s575_s12 = sphi %s607_s12, %s754_s12   ;;  %s571_s11 = sphi %s605_s11, %s753_s11   ;;  %s567_s10 = sphi %s603_s10, %s752_s10   ;;  %s563_s9 = sphi %s601_s9, %s751_s9  }
   0x5   : > { %s626_s15 = sadd.s32 1, %s575_s12   ;;  %s70_s16 = sadd.s32 1, %s571_s11 }
   0x6   : > { %s67_s17 = ssub.s32 %s575_s12, %s626_s15  ;;  %p80_p0 = scmp.ne.s32.totalorder %s571_s11, %s567_s10 }
   0x7   : > { %p68_p1 = scmp.eq.s32.totalorder %s67_s17, 0  ;;  %p81_p2 = scmp.eq.s32.totalorder %s622_s13, 1 }
   0x8   : > { %p86_p3 = scmp.ne.s32.totalorder %s567_s10, %s563_s9  ;;  %p87_p4 = scmp.eq.s32.totalorder %s334_s14, 1 }
   0x9   : > { %s637_s18 = scalar_select %p68_p1, %s571_s11, %s70_s16  }
   0xa   : > { %p639_p5 = por %p81_p2, %p80_p0  ;;  %p643_p6 = por %p87_p4, %p86_p3 }
   0xb   : > { %p335_p7 = scmp.ge.s32.totalorder %s575_s12, 1  ;;  %p94_p8 = scmp.lt.s32.totalorder %s575_s12, 3 }
   0xc   : > { %s742_s19 = scalar_select %p639_p5, 1, 0 }
   0xd   : > { %s743_s20 = scalar_select %p643_p6, 1, 0 }
   0xe   : > { %p739_p9 = scmp.eq.s32.totalorder %s622_s13, 0  ;;  %p650_p10 = pnand %p335_p7, %p94_p8 }
   0xf   : > { %s577_s22 = smov [#allocation2]   ;;  %s481_s27 = scalar_lea.hbm %s737_s1, 2048 }
  0x10   : > { %s744_s21 = scalar_select %p650_p10, 1, 0 }
  0x11   : > { %s106_s23 = sshll.u32 %s577_s22, 4  ;;  %p429_p11 = pneg %p650_p10  ;;  %s107_s23 = int_to_ptr.vmem [resolvable:$true] %s106_s23 }
  0x12   : > { %p482_p13 = scmp.ne.s32.totalorder %s737_s1, %s481_s27  ;;  %p488_p3 = scmp.lt.u32.totalorder %s481_s27, %s737_s1 }
  0x13   : > { %p658_p12 = pnand %p739_p9, %p429_p11 }
  0x15   : > { %p483_p0 = pneg %p658_p12 }
  0x17   : > { %p484_p1 = pnand %p483_p0, %p482_p13 }
  0x19   : > { %p485_p2 = pneg %p484_p1 }
  0x1b   : > { %p490_p4 = pnand %p488_p3, %p485_p2 }
  0x1d   : > { %493 = shalt.err (!%p490_p4)
}
  0x1e   : > { %s494_s4 = scalar_lea.vmem %s107_s23, 2048  ;;  %p502_p9 = scmp.lt.s32.totalorder %s107_s23, %s107_s23 }
  0x1f   : > { %p495_p7 = scmp.ne.s32.totalorder %s107_s23, %s494_s4  ;;  %p503_p6 = scmp.lt.s32.totalorder %s494_s4, %s494_s4 }
  0x21   : > { %p497_p8 = pnand %p495_p7, %p483_p0  ;;  %p504_p5 = por %p503_p6, %p502_p9 }
  0x23   : > { %p498_p11 = pneg %p497_p8 }
  0x25   : > { %p505_p10 = pnand %p504_p5, %p498_p11 }
  0x27   : > { %508 = shalt.err (!%p505_p10)
}
  0x28   : > { %s578_s5 = smov 128   ;;  %s579_s6 = smov 8  }
  0x29   : > { %432 = dma.hbm_to_vmem [thread:$0]  (!%p658_p12), %s737_s1, 2048, %s107_s23, [#allocation3], %s578_s5, %s578_s5, %s579_s6  }
  0x2a   : > { %p746_p13 = scmp.ne.s32.totalorder %s744_s21, 0 }
  0x2b   : > { %p747_p1 = scmp.eq.s32.totalorder (!%p746_p13), %s622_s13, 0 }
  0x2c   : > { %129 = sbr.rel (%p746_p13) target bundleno = 414 (0x19e), region = 28 }
  0x33   : > { %554 = dma.done.wait (%p747_p1), [#allocation3], 2048   ;;  %p748_p0 = pmov %p747_p1 }
  0x34   : > { %p150_p5 = scmp.lt.s32.totalorder %s622_s13, 1  ;;  %v580_v0 = vmov 0   ;;  %v581_v1 = vmov 0.0|0.0   ;;  %v162_v3 = vld [vmem:[#allocation2] sm:$0xff]  ;;  %v163_v4 = vld [vmem:[#allocation2 + $0x8] sm:$0xff]  ;;  %v164_v6 = vld [vmem:[#allocation2 + $0x10] sm:$0xff]  ;;  %v155_v28 = vlaneseq }
  0x35   : > { %556 = vsyncadd (%p748_p0), [#allocation3], 4294965248  ;;  %480 = vset.pattern.permute.xlu0 %v580_v0  ;;  %399 = vmatprep.subr.bf16.mxu0 %v581_v1  ;;  %v400_v5 = vpack.c.bf16 %v163_v4, %v162_v3  ;;  %v165_v7 = vld [vmem:[#allocation2 + $0x18] sm:$0xff]  ;;  %vm582_vm0 = vmmov 0   ;;  %v583_v8 = vmov 0.0   ;;  %v166_v10 = vld [vmem:[#allocation2 + $0x20] sm:$0xff] }
  0x36   : > { %s151_s14 = scalar_select %p150_p5, %s622_s13, 1  ;;  %396 = vmatprep.mubr.msk.f32.mxu0 %vm582_vm0, %v583_v8  ;;  %v403_v9 = vpack.c.bf16 %v165_v7, %v164_v6  ;;  %v167_v11 = vld [vmem:[#allocation2 + $0x28] sm:$0xff]  ;;  %v168_v13 = vld [vmem:[#allocation2 + $0x30] sm:$0xff]  ;;  %v169_v14 = vld [vmem:[#allocation2 + $0x38] sm:$0xff]  ;;  %v156_v29 = vand.u32 127, %v155_v28 }
  0x37   : > { %401 = vmatpush3.bf16.msra.mxu0 %v400_v5  ;;  %v406_v12 = vpack.c.bf16 %v167_v11, %v166_v10  ;;  %v409_v15 = vpack.c.bf16 %v169_v14, %v168_v13  ;;  %v170_v16 = vld [vmem:[#allocation2 + $0x40] sm:$0xff]  ;;  %v171_v17 = vld [vmem:[#allocation2 + $0x48] sm:$0xff]  ;;  %v172_v19 = vld [vmem:[#allocation2 + $0x50] sm:$0xff]  ;;  %v584_v31 = vmov 11.313708   ;;  %s147_s23 = sand.u32 1, %s567_s10  }
  0x38   : > { %s341_s16 = sshll.u32 %s151_s14, 3  ;;  %402 = vmatprep.subr.bf16.mxu0 %v581_v1  ;;  %v412_v18 = vpack.c.bf16 %v171_v17, %v170_v16  ;;  %v173_v20 = vld [vmem:[#allocation2 + $0x58] sm:$0xff]  ;;  %v174_v22 = vld [vmem:[#allocation2 + $0x60] sm:$0xff]  ;;  %v175_v23 = vld [vmem:[#allocation2 + $0x68] sm:$0xff]  ;;  %s340_s24 = sshll.u32 %s147_s23, 3 }
  0x39   : > { %s153_s21 = scalar_lea.vmem %s736_s0, %s341_s16  ;;  %v415_v21 = vpack.c.bf16 %v173_v20, %v172_v19  ;;  %v418_v24 = vpack.c.bf16 %v175_v23, %v174_v22  ;;  %v176_v25 = vld [vmem:[#allocation2 + $0x70] sm:$0xff]  ;;  %v177_v26 = vld [vmem:[#allocation2 + $0x78] sm:$0xff]  ;;  %s149_s25 = scalar_lea.vmem [#allocation5], %s340_s24 }
  0x3a   : > { %v154_v2 = vld [vmem:[%s153_s21] sm:$0xff]  ;;  %v421_v27 = vpack.c.bf16 %v177_v26, %v176_v25  ;;  %s263_s26 = sshll.u32 %s149_s25, 4  ;;  %s344_s27 = sshll.u32 %s622_s13, 7  ;;  %s691_s26 = int_to_ptr.vmem [resolvable:$true] %s263_s26 }
  0x3b   : > { %158 = vperm.xlu0 %480, %v154_v2   ;;  %404 = vmatpush3.bf16.msra.mxu0 %v403_v9  ;;  %s696_s30 = scalar_lea.hbm %s738_s2, %s344_s27  ;;  %s250_s3 = scalar_lea.sflag [#allocation4], %s147_s23 }
  0x3c   : > { %405 = vmatprep.subr.bf16.mxu0 %v581_v1  ;;  %s509_s4 = scalar_lea.vmem %s691_s26, 128  ;;  %p749_p9 = scmp.ne.s32.totalorder %s742_s19, 0 }
  0x3d   : > { %p510_p6 = scmp.ne.s32.totalorder %s691_s26, %s509_s4  ;;  %s585_s13 = smov [#allocation5]  }
  0x3e   : > { %s513_s5 = sshll.u32 %s585_s13, 4  ;;  %s514_s5 = int_to_ptr.vmem [resolvable:$false] %s513_s5 }
  0x3f   : > { %407 = vmatpush3.bf16.msra.mxu0 %v406_v12  ;;  %p511_p10 = pnand %p510_p6, %p749_p9  ;;  %s515_s6 = scalar_lea.vmem %s514_s5, 256 }
  0x40   : > { %408 = vmatprep.subr.bf16.mxu0 %v581_v1  ;;  %p516_p2 = scmp.lt.s32.totalorder %s691_s26, %s514_s5  ;;  %p517_p3 = scmp.lt.s32.totalorder %s515_s6, %s509_s4 }
  0x41   : > { %p512_p12 = pneg %p511_p10 }
  0x42   : > { %p518_p4 = por %p517_p3, %p516_p2 }
  0x43   : > { %410 = vmatpush3.bf16.msra.mxu0 %v409_v15 }
  0x44   : > { %411 = vmatprep.subr.bf16.mxu0 %v581_v1  ;;  %p519_p7 = pnand %p518_p4, %p512_p12 }
  0x47   : > { %413 = vmatpush3.bf16.msra.mxu0 %v412_v18 }
  0x48   : > { %414 = vmatprep.subr.bf16.mxu0 %v581_v1 }
  0x4b   : > { %416 = vmatpush3.bf16.msra.mxu0 %v415_v21 }
  0x4c   : > { %417 = vmatprep.subr.bf16.mxu0 %v581_v1 }
  0x4f   : > { %419 = vmatpush3.bf16.msra.mxu0 %v418_v24 }
  0x50   : > { %420 = vmatprep.subr.bf16.mxu0 %v581_v1 }
  0x53   : > { %422 = vmatpush3.bf16.msra.mxu0 %v421_v27 }
  0xba   : > { %v159_v30 = vpop.permute.xlu0 %158 }
  0xbb   : > { %vm160_vm1 = vcmp.eq.s32.totalorder %v156_v29, %v159_v30 }
  0xbc   : > { %397 = vmatmul.mubr.msk.f32.vlgmr.msra.gmra.mrb[0].mxu0 %vm160_vm1, %v584_v31 }
 0x18f   : > { %v244_v32 = vpop.f32.mrb[0].mxu0 }
 0x190   : > { %248 = vst [vmem:[%s149_s25] sm:$0xff] %v244_v32  ;;  %v398_v33 = vpop.f32.mrb[1].mxu0 }
 0x191   : > { %522 = shalt.err (!%p519_p7)
}
 0x192   : > { %s523_s7 = scalar_lea.hbm %s696_s30, 128  ;;  %s527_s16 = scalar_lea.hbm %s738_s2, 256 }
 0x193   : > { %p524_p8 = scmp.ne.s32.totalorder %s696_s30, %s523_s7  ;;  %p528_p1 = scmp.lt.u32.totalorder %s696_s30, %s738_s2 }
 0x194   : > { %p529_p0 = scmp.lt.u32.totalorder %s527_s16, %s523_s7  ;;  %p531_p6 = scmp.lt.u32.totalorder %s523_s7, %s696_s30 }
 0x195   : > { %p525_p11 = pnand %p524_p8, %p749_p9 }
 0x196   : > { %p530_p5 = por %p529_p0, %p528_p1 }
 0x197   : > { %p526_p13 = pneg %p525_p11 }
 0x198   : > { %p532_p10 = por %p531_p6, %p530_p5 }
 0x19a   : > { %p533_p12 = pnand %p532_p10, %p526_p13 }
 0x19c   : > { %536 = shalt.err (!%p533_p12)
}
 0x19d   : > { %427 = dma.vmem_to_hbm [thread:$0]  (%p749_p9), %s691_s26, 128, %s696_s30, %s250_s3  }
 0x19e PF: > { %p439_p2 = scmp.ge.s32.totalorder %s575_s12, 2  ;;  %s275_s21 = sand.u32 1, %s563_s9  }
 0x19f   : > { %p750_p3 = scmp.ne.s32.totalorder %s743_s20, 0  ;;  %s276_s23 = scalar_lea.sflag [#allocation4], %s275_s21 }
 0x1a1   : > { %p434_p4 = pnand %p439_p2, %p750_p3 }
 0x1a3   : > { %558 = dma.done.wait (!%p434_p4), %s276_s23, 128  }
 0x1a4   : > { %560 = vsyncadd (!%p434_p4), %s276_s23, 4294967168  ;;  %p13_p7 = scmp.ge.s32.totalorder %s626_s15, 4   ;;  %s751_s9 = smov %s567_s10 }
 0x1a5   : > { %s752_s10 = smov %s571_s11  ;;  %s753_s11 = smov %s637_s18 }
 0x1a6   : > { %s754_s12 = smov %s626_s15  ;;  %15 = sbr.rel (!%p13_p7) target bundleno = 4 (0x4), region = 68 }
 0x1ad   :  { %281 = vsyncpa [#allocation3], 1 }
 0x1ae   :  { %283 = vsyncpa [#allocation3 + $0x1], 1 }
 0x1af   :  { %284 = vsyncpa [#allocation4], 1 }
 0x1b0   :  { %286 = vsyncpa [#allocation4 + $0x1], 1 }

</bundles_post_ra>
